<compile_context>
chip_gen: v5e
topology: v5e:2x2
jax: 0.10.0
libtpu: 0.0.40
codegen_flags: <defaults>
</compile_context>

<pallas_src>
import math

import jax
import jax.numpy as jnp
from jax.experimental import pallas as pl
from jax.experimental.pallas import tpu as pltpu

EPS = 1e-5

# Row layout of the packed "vectors" slab (each row is P lanes, zero padded).
_B1, _B2, _B3, _B4, _B5, _B6 = 0, 1, 2, 3, 4, 5
_G1, _BE1, _G2, _BE2, _G4, _BE4, _G5, _BE5 = 6, 7, 8, 9, 10, 11, 12, 13
_NUM_VEC_ROWS = 14


# ---------------------------------------------------------------------------
# Kernel
# ---------------------------------------------------------------------------
def autoencoder_kernel(x_ref, w_ref, vec_ref, out_ref):
    """Full autoencoder forward for one (B, P) block held in VMEM.

    x_ref   : (B, P)       lane-padded activations (P = 128 for input_dim <= 128)
    w_ref   : (6, K, P)    zero-padded weight slab (K = packed max fan-in)
    vec_ref : (16, P)      packed biases / gammas / betas (see row constants)
    out_ref : (B, P)       lane-dense output (sliced back to input_dim by wrapper)
    """
    K = w_ref.shape[1]  # static packed fan-in extent (64 when input_dim <= 64)

    def vec(i):
        # Static row slice of the packed vector slab -> (1, P), free.
        return vec_ref[i:i + 1, :]

    def linear(h, layer, bias_row):
        # Lanes K..P-1 of h are provably zero (zero-padded weight cols + gamma),
        # so the K-lane slice is exact and keeps the weight slab half-size.
        return jnp.dot(h[:, :K], w_ref[layer],
                       preferred_element_type=jnp.float32) + vec(bias_row)

    def batchnorm(h, gamma_row, beta_row):
        # Training-mode BN: batch mean, biased variance; gamma folded into rsqrt.
        mean = jnp.mean(h, axis=0, keepdims=True)
        var = jnp.mean((h - mean) ** 2, axis=0, keepdims=True)
        scale = jax.lax.rsqrt(var + EPS) * vec(gamma_row)
        return (h - mean) * scale + vec(beta_row)

    def relu(h):
        return jnp.maximum(h, 0.0)

    h = x_ref[...]

    # ----- encoder: Linear -> ReLU -> BN, Linear -> ReLU -> BN, Linear -----
    h = batchnorm(relu(linear(h, 0, _B1)), _G1, _BE1)   # D  -> 64
    h = batchnorm(relu(linear(h, 1, _B2)), _G2, _BE2)   # 64 -> 32
    h = linear(h, 2, _B3)                                # 32 -> 16 (encoded)

    # ----- decoder: Linear -> ReLU -> BN, Linear -> ReLU -> BN, Linear -> Sigmoid -----
    h = batchnorm(relu(linear(h, 3, _B4)), _G4, _BE4)   # 16 -> 32
    h = batchnorm(relu(linear(h, 4, _B5)), _G5, _BE5)   # 32 -> 64
    h = linear(h, 5, _B6)                                # 64 -> D
    # Sigmoid via a single EUP tanh op (no VALU divide); full 128-lane store.
    out_ref[...] = 0.5 * jnp.tanh(0.5 * h) + 0.5


# ---------------------------------------------------------------------------
# Parameter construction / packing (done ONCE, outside the per-call path)
# ---------------------------------------------------------------------------
def init_params(key, input_dim, hidden_dims=(64, 32, 16)):
    """PyTorch-style init: Linear ~ U(-1/sqrt(fan_in), 1/sqrt(fan_in)),
    BatchNorm gamma=1, beta=0. Weights stored as (in, out) so y = x @ W + b."""
    enc_dims = [input_dim] + list(hidden_dims)           # [D, 64, 32, 16]
    dec_dims = list(reversed(enc_dims))                  # [16, 32, 64, D]

    params = []

    def add_linear(k, fan_in, fan_out):
        kw, kb = jax.random.split(k)
        bound = 1.0 / math.sqrt(fan_in)
        w = jax.random.uniform(kw, (fan_in, fan_out), jnp.float32, -bound, bound)
        b = jax.random.uniform(kb, (1, fan_out), jnp.float32, -bound, bound)
        params.append(w)
        params.append(b)

    def add_bn(fan_out):
        params.append(jnp.ones((1, fan_out), jnp.float32))    # gamma
        params.append(jnp.zeros((1, fan_out), jnp.float32))   # beta

    keys = jax.random.split(key, 6)
    ki = 0
    for i in range(len(enc_dims) - 1):                    # encoder
        add_linear(keys[ki], enc_dims[i], enc_dims[i + 1]); ki += 1
        if i < len(enc_dims) - 2:
            add_bn(enc_dims[i + 1])
    for i in range(len(dec_dims) - 1):                    # decoder
        add_linear(keys[ki], dec_dims[i], dec_dims[i + 1]); ki += 1
        if i < len(dec_dims) - 2:
            add_bn(dec_dims[i + 1])
    return params


def pack_params(params, input_dim):
    """Pack the 19 parameter arrays into one (6,K,P) weight slab + one (16,P)
    vector slab.  Called once; the results are reused for every forward."""
    P = 128 * pl.cdiv(max(input_dim, 64), 128)   # lane-padded width (>= 128)
    K = 64 if input_dim <= 64 else P             # packed fan-in (sublane) extent

    (w1, b1, g1, be1,
     w2, b2, g2, be2,
     w3, b3,
     w4, b4, g4, be4,
     w5, b5, g5, be5,
     w6, b6) = params

    def pad_w(w):
        fi, fo = w.shape
        return jnp.pad(w, ((0, K - fi), (0, P - fo)))

    def pad_v(v):
        v = v.reshape(1, -1)
        return jnp.pad(v, ((0, 0), (0, P - v.shape[-1])))

    w_slab = jnp.stack([pad_w(w) for w in (w1, w2, w3, w4, w5, w6)], axis=0)

    rows = [b1, b2, b3, b4, b5, b6,              # biases, rows 0..5
            g1, be1, g2, be2, g4, be4, g5, be5]  # BN params, rows 6..13
    vec = jnp.concatenate([pad_v(r) for r in rows], axis=0)       # (14, P)
    vec = jnp.pad(vec, ((0, (-_NUM_VEC_ROWS) % 8), (0, 0)))       # -> (16, P)
    return w_slab, vec


# ---------------------------------------------------------------------------
# Jitted wrapper: pad + pallas_call + slice fuse into one dispatch
# ---------------------------------------------------------------------------
@jax.jit
def autoencoder_forward(x, w_slab, vec):
    B, D = x.shape
    _, K, P = w_slab.shape
    x_pad = jnp.pad(x, ((0, 0), (0, P - D)))

    # VMEM budget audit (single-block design; all bytes below are trace-time ints).
    vmem_bytes = 4 * (2 * B * P + w_slab.size + vec.size)
    if vmem_bytes > (24 << 20):
        # TODO(synk): past this point a batch-group grid with two-pass (global
        # stats) BatchNorm is required to preserve training-mode BN semantics.
        raise ValueError("Batch too large for the single-block training-BN design.")
    vmem_limit = int(min(max(2 * vmem_bytes, 4 << 20), 32 << 20))

    flops = 2 * B * (D * 64 + 64 * 32 + 32 * 16 + 16 * 32 + 32 * 64 + 64 * D)
    transcendentals = B * P + 4 * P               # sigmoid tanh + BN rsqrt
    bytes_accessed = 4 * (x_pad.size + w_slab.size + vec.size + B * P)
    cost = pl.CostEstimate(flops=flops,
                           transcendentals=transcendentals,
                           bytes_accessed=bytes_accessed)

    vmem_spec = pl.BlockSpec(memory_space=pltpu.MemorySpace.VMEM)
    out = pl.pallas_call(
        autoencoder_kernel,
        out_shape=jax.ShapeDtypeStruct((B, P), jnp.float32),
        in_specs=[vmem_spec, vmem_spec, vmem_spec],
        out_specs=vmem_spec,
        cost_estimate=cost,
        compiler_params=pltpu.CompilerParams(vmem_limit_bytes=vmem_limit),
    )(x_pad, w_slab, vec)
    return out[:, :D]


# ---------------------------------------------------------------------------
# Pure-JAX reference (training-mode BN), mirrors the PyTorch module
# ---------------------------------------------------------------------------
def reference_forward(x, params):
    (w1, b1, g1, be1,
     w2, b2, g2, be2,
     w3, b3,
     w4, b4, g4, be4,
     w5, b5, g5, be5,
     w6, b6) = params

    def bn(h, g, be):
        m = jnp.mean(h, axis=0, keepdims=True)
        v = jnp.mean((h - m) ** 2, axis=0, keepdims=True)
        return (h - m) * jax.lax.rsqrt(v + EPS) * g + be

    h = bn(jax.nn.relu(x @ w1 + b1), g1, be1)
    h = bn(jax.nn.relu(h @ w2 + b2), g2, be2)
    h = h @ w3 + b3
    h = bn(jax.nn.relu(h @ w4 + b4), g4, be4)
    h = bn(jax.nn.relu(h @ w5 + b5), g5, be5)
    h = h @ w6 + b6
    return 0.5 * jnp.tanh(0.5 * h) + 0.5   # sigmoid (same formulation as kernel)


if __name__ == "__main__":
    B = 8           # batch
    INPUT_DIM = 32  # feature dimension

    key = jax.random.PRNGKey(0)
    kx, kp = jax.random.split(key)

    x = jax.random.normal(kx, (B, INPUT_DIM), dtype=jnp.float32)
    params = init_params(kp, INPUT_DIM)

    # Pack once (outside the per-call path); reuse for every forward.
    w_slab, vec = pack_params(params, INPUT_DIM)
    w_slab, vec = jax.block_until_ready((w_slab, vec))

    out = autoencoder_forward(x, w_slab, vec)
    out = jax.block_until_ready(out)

    ref = reference_forward(x, params)
    assert out.shape == (B, INPUT_DIM)
    assert jnp.allclose(out, ref, atol=1e-5, rtol=1e-5), "mismatch vs JAX reference"

    print("KERNEL_OK")
</pallas_src>

<mosaic_0001>
module attributes {stable_mosaic.version = 11 : i64} {
  func.func @autoencoder_kernel(%arg0: memref<8x128xf32, #tpu.memory_space<vmem>>, %arg1: memref<6x64x128xf32, #tpu.memory_space<vmem>>, %arg2: memref<16x128xf32, #tpu.memory_space<vmem>>, %arg3: memref<8x128xf32, #tpu.memory_space<vmem>>) attributes {dimension_semantics = [], scalar_prefetch = 0 : i64, scratch_operands = 0 : i64, tpu.core_type = #tpu.core_type<tc>} {
    %c0 = arith.constant 0 : index
    %c0_0 = arith.constant 0 : index
    %0 = vector.load %arg0[%c0, %c0_0] : memref<8x128xf32, #tpu.memory_space<vmem>>, vector<8x128xf32>
    %1 = vector.extract_strided_slice %0 {offsets = [0, 0], sizes = [8, 64], strides = [1, 1]} : vector<8x128xf32> to vector<8x64xf32>
    %c0_1 = arith.constant 0 : index
    %c0_2 = arith.constant 0 : index
    %c0_3 = arith.constant 0 : index
    %2 = vector.load %arg1[%c0_1, %c0_2, %c0_3] : memref<6x64x128xf32, #tpu.memory_space<vmem>>, vector<1x64x128xf32>
    %3 = vector.shape_cast %2 : vector<1x64x128xf32> to vector<64x128xf32>
    %cst = arith.constant dense<0.000000e+00> : vector<8x128xf32>
    %4 = tpu.matmul %1, %3, %cst {dimension_numbers = #tpu.dot_dimension_numbers<[1], [0], [0], [1], [0, 0, 1, 1], [], []>} : vector<8x64xf32>, vector<64x128xf32>, vector<8x128xf32> -> vector<8x128xf32>
    %c0_4 = arith.constant 0 : index
    %c0_5 = arith.constant 0 : index
    %5 = vector.load %arg2[%c0_4, %c0_5] : memref<16x128xf32, #tpu.memory_space<vmem>>, vector<1x128xf32>
    %6 = vector.broadcast %5 : vector<1x128xf32> to vector<8x128xf32>
    %7 = arith.addf %4, %6 : vector<8x128xf32>
    %cst_6 = arith.constant 0.000000e+00 : f32
    %8 = vector.broadcast %cst_6 : f32 to vector<8x128xf32>
    %9 = arith.maximumf %7, %8 : vector<8x128xf32>
    %cst_7 = arith.constant dense<0.000000e+00> : vector<128xf32>
    %10 = vector.multi_reduction <add>, %9, %cst_7 [0] : vector<8x128xf32> to vector<128xf32>
    %11 = vector.shape_cast %10 : vector<128xf32> to vector<1x128xf32>
    %cst_8 = arith.constant 8.000000e+00 : f32
    %12 = vector.broadcast %cst_8 : f32 to vector<1x128xf32>
    %13 = arith.divf %11, %12 : vector<1x128xf32>
    %14 = vector.broadcast %13 : vector<1x128xf32> to vector<8x128xf32>
    %15 = arith.subf %9, %14 : vector<8x128xf32>
    %16 = arith.mulf %15, %15 : vector<8x128xf32>
    %cst_9 = arith.constant dense<0.000000e+00> : vector<128xf32>
    %17 = vector.multi_reduction <add>, %16, %cst_9 [0] : vector<8x128xf32> to vector<128xf32>
    %18 = vector.shape_cast %17 : vector<128xf32> to vector<1x128xf32>
    %cst_10 = arith.constant 8.000000e+00 : f32
    %19 = vector.broadcast %cst_10 : f32 to vector<1x128xf32>
    %20 = arith.divf %18, %19 : vector<1x128xf32>
    %cst_11 = arith.constant 9.99999974E-6 : f32
    %21 = vector.broadcast %cst_11 : f32 to vector<1x128xf32>
    %22 = arith.addf %20, %21 : vector<1x128xf32>
    %23 = math.rsqrt %22 : vector<1x128xf32>
    %c6 = arith.constant 6 : index
    %c0_12 = arith.constant 0 : index
    %24 = vector.load %arg2[%c6, %c0_12] : memref<16x128xf32, #tpu.memory_space<vmem>>, vector<1x128xf32>
    %25 = arith.mulf %23, %24 : vector<1x128xf32>
    %26 = vector.broadcast %13 : vector<1x128xf32> to vector<8x128xf32>
    %27 = arith.subf %9, %26 : vector<8x128xf32>
    %28 = vector.broadcast %25 : vector<1x128xf32> to vector<8x128xf32>
    %29 = arith.mulf %27, %28 : vector<8x128xf32>
    %c7 = arith.constant 7 : index
    %c0_13 = arith.constant 0 : index
    %30 = vector.load %arg2[%c7, %c0_13] : memref<16x128xf32, #tpu.memory_space<vmem>>, vector<1x128xf32>
    %31 = vector.broadcast %30 : vector<1x128xf32> to vector<8x128xf32>
    %32 = arith.addf %29, %31 : vector<8x128xf32>
    %33 = vector.extract_strided_slice %32 {offsets = [0, 0], sizes = [8, 64], strides = [1, 1]} : vector<8x128xf32> to vector<8x64xf32>
    %c1 = arith.constant 1 : index
    %c0_14 = arith.constant 0 : index
    %c0_15 = arith.constant 0 : index
    %34 = vector.load %arg1[%c1, %c0_14, %c0_15] : memref<6x64x128xf32, #tpu.memory_space<vmem>>, vector<1x64x128xf32>
    %35 = vector.shape_cast %34 : vector<1x64x128xf32> to vector<64x128xf32>
    %cst_16 = arith.constant dense<0.000000e+00> : vector<8x128xf32>
    %36 = tpu.matmul %33, %35, %cst_16 {dimension_numbers = #tpu.dot_dimension_numbers<[1], [0], [0], [1], [0, 0, 1, 1], [], []>} : vector<8x64xf32>, vector<64x128xf32>, vector<8x128xf32> -> vector<8x128xf32>
    %c1_17 = arith.constant 1 : index
    %c0_18 = arith.constant 0 : index
    %37 = vector.load %arg2[%c1_17, %c0_18] : memref<16x128xf32, #tpu.memory_space<vmem>>, vector<1x128xf32>
    %38 = vector.broadcast %37 : vector<1x128xf32> to vector<8x128xf32>
    %39 = arith.addf %36, %38 : vector<8x128xf32>
    %cst_19 = arith.constant 0.000000e+00 : f32
    %40 = vector.broadcast %cst_19 : f32 to vector<8x128xf32>
    %41 = arith.maximumf %39, %40 : vector<8x128xf32>
    %cst_20 = arith.constant dense<0.000000e+00> : vector<128xf32>
    %42 = vector.multi_reduction <add>, %41, %cst_20 [0] : vector<8x128xf32> to vector<128xf32>
    %43 = vector.shape_cast %42 : vector<128xf32> to vector<1x128xf32>
    %cst_21 = arith.constant 8.000000e+00 : f32
    %44 = vector.broadcast %cst_21 : f32 to vector<1x128xf32>
    %45 = arith.divf %43, %44 : vector<1x128xf32>
    %46 = vector.broadcast %45 : vector<1x128xf32> to vector<8x128xf32>
    %47 = arith.subf %41, %46 : vector<8x128xf32>
    %48 = arith.mulf %47, %47 : vector<8x128xf32>
    %cst_22 = arith.constant dense<0.000000e+00> : vector<128xf32>
    %49 = vector.multi_reduction <add>, %48, %cst_22 [0] : vector<8x128xf32> to vector<128xf32>
    %50 = vector.shape_cast %49 : vector<128xf32> to vector<1x128xf32>
    %cst_23 = arith.constant 8.000000e+00 : f32
    %51 = vector.broadcast %cst_23 : f32 to vector<1x128xf32>
    %52 = arith.divf %50, %51 : vector<1x128xf32>
    %cst_24 = arith.constant 9.99999974E-6 : f32
    %53 = vector.broadcast %cst_24 : f32 to vector<1x128xf32>
    %54 = arith.addf %52, %53 : vector<1x128xf32>
    %55 = math.rsqrt %54 : vector<1x128xf32>
    %c8 = arith.constant 8 : index
    %c0_25 = arith.constant 0 : index
    %56 = vector.load %arg2[%c8, %c0_25] : memref<16x128xf32, #tpu.memory_space<vmem>>, vector<1x128xf32>
    %57 = arith.mulf %55, %56 : vector<1x128xf32>
    %58 = vector.broadcast %45 : vector<1x128xf32> to vector<8x128xf32>
    %59 = arith.subf %41, %58 : vector<8x128xf32>
    %60 = vector.broadcast %57 : vector<1x128xf32> to vector<8x128xf32>
    %61 = arith.mulf %59, %60 : vector<8x128xf32>
    %c9 = arith.constant 9 : index
    %c0_26 = arith.constant 0 : index
    %62 = vector.load %arg2[%c9, %c0_26] : memref<16x128xf32, #tpu.memory_space<vmem>>, vector<1x128xf32>
    %63 = vector.broadcast %62 : vector<1x128xf32> to vector<8x128xf32>
    %64 = arith.addf %61, %63 : vector<8x128xf32>
    %65 = vector.extract_strided_slice %64 {offsets = [0, 0], sizes = [8, 64], strides = [1, 1]} : vector<8x128xf32> to vector<8x64xf32>
    %c2 = arith.constant 2 : index
    %c0_27 = arith.constant 0 : index
    %c0_28 = arith.constant 0 : index
    %66 = vector.load %arg1[%c2, %c0_27, %c0_28] : memref<6x64x128xf32, #tpu.memory_space<vmem>>, vector<1x64x128xf32>
    %67 = vector.shape_cast %66 : vector<1x64x128xf32> to vector<64x128xf32>
    %cst_29 = arith.constant dense<0.000000e+00> : vector<8x128xf32>
    %68 = tpu.matmul %65, %67, %cst_29 {dimension_numbers = #tpu.dot_dimension_numbers<[1], [0], [0], [1], [0, 0, 1, 1], [], []>} : vector<8x64xf32>, vector<64x128xf32>, vector<8x128xf32> -> vector<8x128xf32>
    %c2_30 = arith.constant 2 : index
    %c0_31 = arith.constant 0 : index
    %69 = vector.load %arg2[%c2_30, %c0_31] : memref<16x128xf32, #tpu.memory_space<vmem>>, vector<1x128xf32>
    %70 = vector.broadcast %69 : vector<1x128xf32> to vector<8x128xf32>
    %71 = arith.addf %68, %70 : vector<8x128xf32>
    %72 = vector.extract_strided_slice %71 {offsets = [0, 0], sizes = [8, 64], strides = [1, 1]} : vector<8x128xf32> to vector<8x64xf32>
    %c3 = arith.constant 3 : index
    %c0_32 = arith.constant 0 : index
    %c0_33 = arith.constant 0 : index
    %73 = vector.load %arg1[%c3, %c0_32, %c0_33] : memref<6x64x128xf32, #tpu.memory_space<vmem>>, vector<1x64x128xf32>
    %74 = vector.shape_cast %73 : vector<1x64x128xf32> to vector<64x128xf32>
    %cst_34 = arith.constant dense<0.000000e+00> : vector<8x128xf32>
    %75 = tpu.matmul %72, %74, %cst_34 {dimension_numbers = #tpu.dot_dimension_numbers<[1], [0], [0], [1], [0, 0, 1, 1], [], []>} : vector<8x64xf32>, vector<64x128xf32>, vector<8x128xf32> -> vector<8x128xf32>
    %c3_35 = arith.constant 3 : index
    %c0_36 = arith.constant 0 : index
    %76 = vector.load %arg2[%c3_35, %c0_36] : memref<16x128xf32, #tpu.memory_space<vmem>>, vector<1x128xf32>
    %77 = vector.broadcast %76 : vector<1x128xf32> to vector<8x128xf32>
    %78 = arith.addf %75, %77 : vector<8x128xf32>
    %cst_37 = arith.constant 0.000000e+00 : f32
    %79 = vector.broadcast %cst_37 : f32 to vector<8x128xf32>
    %80 = arith.maximumf %78, %79 : vector<8x128xf32>
    %cst_38 = arith.constant dense<0.000000e+00> : vector<128xf32>
    %81 = vector.multi_reduction <add>, %80, %cst_38 [0] : vector<8x128xf32> to vector<128xf32>
    %82 = vector.shape_cast %81 : vector<128xf32> to vector<1x128xf32>
    %cst_39 = arith.constant 8.000000e+00 : f32
    %83 = vector.broadcast %cst_39 : f32 to vector<1x128xf32>
    %84 = arith.divf %82, %83 : vector<1x128xf32>
    %85 = vector.broadcast %84 : vector<1x128xf32> to vector<8x128xf32>
    %86 = arith.subf %80, %85 : vector<8x128xf32>
    %87 = arith.mulf %86, %86 : vector<8x128xf32>
    %cst_40 = arith.constant dense<0.000000e+00> : vector<128xf32>
    %88 = vector.multi_reduction <add>, %87, %cst_40 [0] : vector<8x128xf32> to vector<128xf32>
    %89 = vector.shape_cast %88 : vector<128xf32> to vector<1x128xf32>
    %cst_41 = arith.constant 8.000000e+00 : f32
    %90 = vector.broadcast %cst_41 : f32 to vector<1x128xf32>
    %91 = arith.divf %89, %90 : vector<1x128xf32>
    %cst_42 = arith.constant 9.99999974E-6 : f32
    %92 = vector.broadcast %cst_42 : f32 to vector<1x128xf32>
    %93 = arith.addf %91, %92 : vector<1x128xf32>
    %94 = math.rsqrt %93 : vector<1x128xf32>
    %c10 = arith.constant 10 : index
    %c0_43 = arith.constant 0 : index
    %95 = vector.load %arg2[%c10, %c0_43] : memref<16x128xf32, #tpu.memory_space<vmem>>, vector<1x128xf32>
    %96 = arith.mulf %94, %95 : vector<1x128xf32>
    %97 = vector.broadcast %84 : vector<1x128xf32> to vector<8x128xf32>
    %98 = arith.subf %80, %97 : vector<8x128xf32>
    %99 = vector.broadcast %96 : vector<1x128xf32> to vector<8x128xf32>
    %100 = arith.mulf %98, %99 : vector<8x128xf32>
    %c11 = arith.constant 11 : index
    %c0_44 = arith.constant 0 : index
    %101 = vector.load %arg2[%c11, %c0_44] : memref<16x128xf32, #tpu.memory_space<vmem>>, vector<1x128xf32>
    %102 = vector.broadcast %101 : vector<1x128xf32> to vector<8x128xf32>
    %103 = arith.addf %100, %102 : vector<8x128xf32>
    %104 = vector.extract_strided_slice %103 {offsets = [0, 0], sizes = [8, 64], strides = [1, 1]} : vector<8x128xf32> to vector<8x64xf32>
    %c4 = arith.constant 4 : index
    %c0_45 = arith.constant 0 : index
    %c0_46 = arith.constant 0 : index
    %105 = vector.load %arg1[%c4, %c0_45, %c0_46] : memref<6x64x128xf32, #tpu.memory_space<vmem>>, vector<1x64x128xf32>
    %106 = vector.shape_cast %105 : vector<1x64x128xf32> to vector<64x128xf32>
    %cst_47 = arith.constant dense<0.000000e+00> : vector<8x128xf32>
    %107 = tpu.matmul %104, %106, %cst_47 {dimension_numbers = #tpu.dot_dimension_numbers<[1], [0], [0], [1], [0, 0, 1, 1], [], []>} : vector<8x64xf32>, vector<64x128xf32>, vector<8x128xf32> -> vector<8x128xf32>
    %c4_48 = arith.constant 4 : index
    %c0_49 = arith.constant 0 : index
    %108 = vector.load %arg2[%c4_48, %c0_49] : memref<16x128xf32, #tpu.memory_space<vmem>>, vector<1x128xf32>
    %109 = vector.broadcast %108 : vector<1x128xf32> to vector<8x128xf32>
    %110 = arith.addf %107, %109 : vector<8x128xf32>
    %cst_50 = arith.constant 0.000000e+00 : f32
    %111 = vector.broadcast %cst_50 : f32 to vector<8x128xf32>
    %112 = arith.maximumf %110, %111 : vector<8x128xf32>
    %cst_51 = arith.constant dense<0.000000e+00> : vector<128xf32>
    %113 = vector.multi_reduction <add>, %112, %cst_51 [0] : vector<8x128xf32> to vector<128xf32>
    %114 = vector.shape_cast %113 : vector<128xf32> to vector<1x128xf32>
    %cst_52 = arith.constant 8.000000e+00 : f32
    %115 = vector.broadcast %cst_52 : f32 to vector<1x128xf32>
    %116 = arith.divf %114, %115 : vector<1x128xf32>
    %117 = vector.broadcast %116 : vector<1x128xf32> to vector<8x128xf32>
    %118 = arith.subf %112, %117 : vector<8x128xf32>
    %119 = arith.mulf %118, %118 : vector<8x128xf32>
    %cst_53 = arith.constant dense<0.000000e+00> : vector<128xf32>
    %120 = vector.multi_reduction <add>, %119, %cst_53 [0] : vector<8x128xf32> to vector<128xf32>
    %121 = vector.shape_cast %120 : vector<128xf32> to vector<1x128xf32>
    %cst_54 = arith.constant 8.000000e+00 : f32
    %122 = vector.broadcast %cst_54 : f32 to vector<1x128xf32>
    %123 = arith.divf %121, %122 : vector<1x128xf32>
    %cst_55 = arith.constant 9.99999974E-6 : f32
    %124 = vector.broadcast %cst_55 : f32 to vector<1x128xf32>
    %125 = arith.addf %123, %124 : vector<1x128xf32>
    %126 = math.rsqrt %125 : vector<1x128xf32>
    %c12 = arith.constant 12 : index
    %c0_56 = arith.constant 0 : index
    %127 = vector.load %arg2[%c12, %c0_56] : memref<16x128xf32, #tpu.memory_space<vmem>>, vector<1x128xf32>
    %128 = arith.mulf %126, %127 : vector<1x128xf32>
    %129 = vector.broadcast %116 : vector<1x128xf32> to vector<8x128xf32>
    %130 = arith.subf %112, %129 : vector<8x128xf32>
    %131 = vector.broadcast %128 : vector<1x128xf32> to vector<8x128xf32>
    %132 = arith.mulf %130, %131 : vector<8x128xf32>
    %c13 = arith.constant 13 : index
    %c0_57 = arith.constant 0 : index
    %133 = vector.load %arg2[%c13, %c0_57] : memref<16x128xf32, #tpu.memory_space<vmem>>, vector<1x128xf32>
    %134 = vector.broadcast %133 : vector<1x128xf32> to vector<8x128xf32>
    %135 = arith.addf %132, %134 : vector<8x128xf32>
    %136 = vector.extract_strided_slice %135 {offsets = [0, 0], sizes = [8, 64], strides = [1, 1]} : vector<8x128xf32> to vector<8x64xf32>
    %c5 = arith.constant 5 : index
    %c0_58 = arith.constant 0 : index
    %c0_59 = arith.constant 0 : index
    %137 = vector.load %arg1[%c5, %c0_58, %c0_59] : memref<6x64x128xf32, #tpu.memory_space<vmem>>, vector<1x64x128xf32>
    %138 = vector.shape_cast %137 : vector<1x64x128xf32> to vector<64x128xf32>
    %cst_60 = arith.constant dense<0.000000e+00> : vector<8x128xf32>
    %139 = tpu.matmul %136, %138, %cst_60 {dimension_numbers = #tpu.dot_dimension_numbers<[1], [0], [0], [1], [0, 0, 1, 1], [], []>} : vector<8x64xf32>, vector<64x128xf32>, vector<8x128xf32> -> vector<8x128xf32>
    %c5_61 = arith.constant 5 : index
    %c0_62 = arith.constant 0 : index
    %140 = vector.load %arg2[%c5_61, %c0_62] : memref<16x128xf32, #tpu.memory_space<vmem>>, vector<1x128xf32>
    %141 = vector.broadcast %140 : vector<1x128xf32> to vector<8x128xf32>
    %142 = arith.addf %139, %141 : vector<8x128xf32>
    %cst_63 = arith.constant 5.000000e-01 : f32
    %143 = vector.broadcast %cst_63 : f32 to vector<8x128xf32>
    %144 = arith.mulf %143, %142 : vector<8x128xf32>
    %145 = math.tanh %144 : vector<8x128xf32>
    %cst_64 = arith.constant 5.000000e-01 : f32
    %146 = vector.broadcast %cst_64 : f32 to vector<8x128xf32>
    %147 = arith.mulf %146, %145 : vector<8x128xf32>
    %cst_65 = arith.constant 5.000000e-01 : f32
    %148 = vector.broadcast %cst_65 : f32 to vector<8x128xf32>
    %149 = arith.addf %147, %148 : vector<8x128xf32>
    %c0_66 = arith.constant 0 : index
    %c0_67 = arith.constant 0 : index
    %150 = vector.load %arg3[%c0_66, %c0_67] : memref<8x128xf32, #tpu.memory_space<vmem>>, vector<8x128xf32>
    tpu.vector_store %arg3[%c0_66, %c0_67], %149 {strides = array<i32>} : memref<8x128xf32, #tpu.memory_space<vmem>>, vector<8x128xf32>,
    return
  }
}

</mosaic_0001>

<bundles_post_ra>
// kernel: autoencoder_forward.1
= control target key start
LH: loop header
LB: loop body
LE: loop exit
PB: predicated region body
PF: predicated region fallthrough
CT: control target
= control target key end

     0   :  { %8 = vsyncpa [#allocation3], 0  ;;  %s582_s0 = inlined_call_operand.vmem [shape: f32[8,128], index: 0, kind: input, shape index: {}]   ;;  %s583_s1 = inlined_call_operand.hbm [shape: f32[6,64,128], index: 1, kind: input, shape index: {}]   ;;  %s584_s2 = inlined_call_operand.vmem [shape: f32[16,128], index: 2, kind: input, shape index: {}]   ;;  %s585_s3 = inlined_call_operand.hbm [shape: f32[8,128], index: 3, kind: output, shape index: {}]  }
   0x1   :  { %9 = vsyncpa [#allocation4], 0  ;;  %s16_s14 = sshll.u32 %s583_s1, 4  ;;  %s490_s15 = smov [#allocation2]   ;;  %s17_s14 = int_to_ptr.hbm [resolvable:$true] %s16_s14 }
   0x2   :  { %s18_s16 = sshll.u32 %s490_s15, 4  ;;  %s491_s17 = smov 128   ;;  %s19_s16 = int_to_ptr.vmem [resolvable:$true] %s18_s16 }
   0x3   :  { %s492_s18 = smov 8  }
   0x4   :  { %24 = dma.hbm_to_vmem [thread:$0]  %s17_s14, 6144, %s19_s16, [#allocation3], %s491_s17, %s491_s17, %s492_s18  }
   0x5   :  { %486 = dma.done.wait [#allocation3], 6144  }
   0x6   :  { %487 = vsyncadd [#allocation3], 4294961152  ;;  %v39_v0 = vld [vmem:[#allocation2 + $0x38] sm:$0xff]  ;;  %v38_v1 = vld [vmem:[#allocation2 + $0x30] sm:$0xff]  ;;  %vm42_vm0 = vcmask 523264   ;;  %v493_v9 = vmov 8.0  }
   0x7   :  { %54 = vmatpush.msra.mxu0 %v39_v0  ;;  %v37_v2 = vld [vmem:[#allocation2 + $0x28] sm:$0xff]  ;;  %v36_v3 = vld [vmem:[#allocation2 + $0x20] sm:$0xff]  ;;  %v35_v4 = vld [vmem:[#allocation2 + $0x18] sm:$0xff]  ;;  %426 = vrcp.f32 %v493_v9  ;;  %s494_s19 = smov [#allocation5]   ;;  %s395_s22 = sshll.u32 %s585_s3, 4  ;;  %s396_s22 = int_to_ptr.hbm [resolvable:$true] %s395_s22 }
   0x8   :  { %v34_v5 = vld [vmem:[#allocation2 + $0x10] sm:$0xff]  ;;  %v33_v6 = vld [vmem:[#allocation2 + $0x8] sm:$0xff]  ;;  %v32_v7 = vld [vmem:[#allocation2] sm:$0xff]  ;;  %s393_s20 = sshll.u32 %s494_s19, 4  ;;  %s394_s20 = int_to_ptr.vmem [resolvable:$true] %s393_s20 }
   0x9   :  { %55 = vmatpush.msra.mxu0 %v38_v1  ;;  %v31_v8 = vld [vmem:[%s582_s0] sm:$0xff]  ;;  %v116_v20 = vld [vmem:[#allocation2 + $0x78] sm:$0xff]  ;;  %v115_v21 = vld [vmem:[#allocation2 + $0x70] sm:$0xff] }
   0xa   :  { %v416_v11 = vld [vmem:[%s584_s2] ss:$0 sm:$0xff]  ;;  %130 = vmatpush.msra.mxu1 %v116_v20  ;;  %v114_v23 = vld [vmem:[#allocation2 + $0x68] sm:$0xff]  ;;  %v112_v28 = vld [vmem:[#allocation2 + $0x58] sm:$0xff] }
   0xb   :  { %56 = vmatpush.msra.mxu0 %v37_v2  ;;  %v113_v26 = vld [vmem:[#allocation2 + $0x60] sm:$0xff]  ;;  %v111_v31 = vld [vmem:[#allocation2 + $0x50] sm:$0xff]  ;;  %v110_v33 = vld [vmem:[#allocation2 + $0x48] sm:$0xff] }
   0xc   :  { %131 = vmatpush.msra.mxu1 %v115_v21  ;;  %v109_v35 = vld [vmem:[#allocation2 + $0x40] sm:$0xff]  ;;  %v185_v0 = vld [vmem:[#allocation2 + $0xb8] sm:$0xff]  ;;  %v184_v1 = vld [vmem:[#allocation2 + $0xb0] sm:$0xff] }
   0xd   :  { %57 = vmatpush.msra.mxu0 %v36_v3  ;;  %v427_v10 = vpop.eup %426  ;;  %v101_v51 = vld [vmem:[%s584_s2 + $0x6] sm:$0x1]  ;;  %v417_v55 = vld [vmem:[%s584_s2 + $0x7] ss:$0 sm:$0xff]  ;;  %v418_v58 = vld [vmem:[%s584_s2 + $0x1] ss:$0 sm:$0xff]  ;;  %199 = vmatpush.msra.mxu2 %v185_v0 }
   0xe   :  { %v74_v12 = vmul.f32 8.0, %v427_v10  ;;  %vm78_vm1 = vweird.f32 %v427_v10  ;;  %132 = vmatpush.msra.mxu1 %v114_v23  ;;  %v183_v3 = vld [vmem:[#allocation2 + $0xa8] sm:$0xff]  ;;  %v180_v9 = vld [vmem:[#allocation2 + $0x90] sm:$0xff]  ;;  %v219_v21 = vld [vmem:[#allocation2 + $0xf8] sm:$0xff] }
   0xf   :  { %58 = vmatpush.msra.mxu0 %v35_v4  ;;  %200 = vmatpush.msra.mxu2 %v184_v1  ;;  %v285_v1 = vld [vmem:[#allocation2 + $0x120] sm:$0xff] }
  0x10   :  { %v75_v15 = vsub.f32 1.0, %v74_v12  ;;  %133 = vmatpush.msra.mxu1 %v113_v26  ;;  %233 = vmatpush.msra.mxu3 %v219_v21  ;;  %v216_v26 = vld [vmem:[#allocation2 + $0xe0] sm:$0xff] }
  0x11   :  { %59 = vmatpush.msra.mxu0 %v34_v5  ;;  %v182_v5 = vld [vmem:[#allocation2 + $0xa0] sm:$0xff]  ;;  %201 = vmatpush.msra.mxu2 %v183_v3  ;;  %v284_v3 = vld [vmem:[#allocation2 + $0x118] sm:$0xff] }
  0x12   :  { %v76_v18 = vmul.f32 %v427_v10, %v75_v15  ;;  %134 = vmatpush.msra.mxu1 %v112_v28  ;;  %v214_v28 = vld [vmem:[#allocation2 + $0xd0] sm:$0xff] }
  0x13   :  { %60 = vmatpush.msra.mxu0 %v33_v6  ;;  %202 = vmatpush.msra.mxu2 %v182_v5  ;;  %v283_v5 = vld [vmem:[#allocation2 + $0x110] sm:$0xff] }
  0x14   :  { %v77_v24 = vadd.f32 %v427_v10, %v76_v18  ;;  %135 = vmatpush.msra.mxu1 %v111_v31 }
  0x15   :  { %61 = vmatpush.msra.mxu0 %v32_v7  ;;  %v181_v7 = vld [vmem:[#allocation2 + $0x98] sm:$0xff] }
  0x16   :  { %405 = vmatmul.msk.f32.vlgmr.msra.gmra.mxu0 %vm42_vm0, %v31_v8  ;;  %v525_v29 = vsel %vm78_vm1, %v427_v10, %v77_v24  ;;  %136 = vmatpush.msra.mxu1 %v110_v33  ;;  %v217_v24 = vld [vmem:[#allocation2 + $0xe8] sm:$0xff] }
  0x17   :  { %203 = vmatpush.msra.mxu2 %v181_v7  ;;  %v282_v7 = vld [vmem:[#allocation2 + $0x108] sm:$0xff] }
  0x18   :  { %137 = vmatpush.msra.mxu1 %v109_v35 }
  0x19   :  { %204 = vmatpush.msra.mxu2 %v180_v9 }
  0x93   :  { %v63_v13 = vpop.f32.mrf.mxu0 }
  0x94   :  { %v64_v14 = vadd.f32 %v416_v11, %v63_v13  ;;  %v179_v11 = vld [vmem:[#allocation2 + $0x88] sm:$0xff]  ;;  %v178_v13 = vld [vmem:[#allocation2 + $0x80] sm:$0xff] }
  0x95   :  { %205 = vmatpush.msra.mxu2 %v179_v11 }
  0x96   :  { %v66_v16 = vmax.f32 %v64_v14, 0.0 }
  0x97   :  { %206 = vmatpush.msra.mxu2 %v178_v13 }
  0x98   :  { %v67_v17 = vrot.slane %v66_v16, 4 }
  0x9a   :  { %v68_v19 = vadd.f32 %v67_v17, %v66_v16 }
  0x9c   :  { %v69_v22 = vrot.slane %v68_v19, 2 }
  0x9e   :  { %v70_v25 = vadd.f32 %v69_v22, %v68_v19  ;;  %v218_v22 = vld [vmem:[#allocation2 + $0xf0] sm:$0xff] }
  0x9f   :  { %234 = vmatpush.msra.mxu3 %v218_v22 }
  0xa0   :  { %v71_v27 = vrot.slane %v70_v25, 1 }
  0xa1   :  { %235 = vmatpush.msra.mxu3 %v217_v24 }
  0xa2   :  { %v72_v30 = vadd.f32 %v71_v27, %v70_v25  ;;  %v215_v27 = vld [vmem:[#allocation2 + $0xd8] sm:$0xff] }
  0xa3   :  { %236 = vmatpush.msra.mxu3 %v216_v26  ;;  %v423_v26 = vld [vmem:[%s584_s2 + $0x4] ss:$0 sm:$0xff] }
  0xa4   :  { %v80_v32 = vmul.f32 %v525_v29, %v72_v30 }
  0xa5   :  { %237 = vmatpush.msra.mxu3 %v215_v27 }
  0xa6   :  { %v81_v34 = vsub.f32 %v66_v16, %v80_v32 }
  0xa7   :  { %238 = vmatpush.msra.mxu3 %v214_v28 }
  0xa8   :  { %v82_v36 = vmul.f32 %v81_v34, %v81_v34 }
  0xaa   :  { %v83_v37 = vrot.slane %v82_v36, 4 }
  0xac   :  { %v84_v38 = vadd.f32 %v83_v37, %v82_v36  ;;  %v170_v36 = vld [vmem:[%s584_s2 + $0x8] sm:$0x1] }
  0xae   :  { %v85_v39 = vrot.slane %v84_v38, 2 }
  0xb0   :  { %v86_v40 = vadd.f32 %v85_v39, %v84_v38 }
  0xb2   :  { %v87_v41 = vrot.slane %v86_v40, 1 }
  0xb4   :  { %v88_v42 = vadd.f32 %v87_v41, %v86_v40  ;;  %v419_v40 = vld [vmem:[%s584_s2 + $0x9] ss:$0 sm:$0xff] }
  0xb6   :  { %v89_v43 = vmul.f32 %v88_v42, %v525_v29 }
  0xb8   :  { %v90_v44 = vadd.f32 1e-05, %v89_v43  ;;  %v213_v43 = vld [vmem:[#allocation2 + $0xc8] sm:$0xff] }
  0xb9   :  { %239 = vmatpush.msra.mxu3 %v213_v43 }
  0xba   :  { %428 = vrsqrt.f32 %v90_v44  ;;  %vm97_vm3 = vweird.f32 %v90_v44 }
  0xc0   :  { %v429_v45 = vpop.eup %428 }
  0xc1   :  { %v92_v46 = vmul.f32 %v429_v45, %v90_v44  ;;  %vm98_vm2 = vweird.f32 %v429_v45  ;;  %v212_v44 = vld [vmem:[#allocation2 + $0xc0] sm:$0xff] }
  0xc2   :  { %vm99_vm4 = vmor %vm97_vm3, %vm98_vm2  ;;  %240 = vmatpush.msra.mxu3 %v212_v44  ;;  %v354_v44 = vld [vmem:[#allocation2 + $0x160] sm:$0xff] }
  0xc3   :  { %v93_v47 = vmul.f32 %v429_v45, %v92_v46 }
  0xc5   :  { %v94_v48 = vmul.f32 0.5, %v93_v47 }
  0xc7   :  { %v95_v49 = vsub.f32 1.5, %v94_v48  ;;  %v421_v48 = vld [vmem:[%s584_s2 + $0x3] ss:$0 sm:$0xff] }
  0xc9   :  { %v96_v50 = vmul.f32 %v429_v45, %v95_v49 }
  0xcb   :  { %v100_v52 = vsel %vm99_vm4, %v429_v45, %v96_v50  ;;  %v420_v45 = vld [vmem:[%s584_s2 + $0x2] ss:$0 sm:$0xff] }
  0xcc   :  { %v102_v53 = vmul.f32 %v101_v51, %v100_v52 }
  0xce   :  { %v103_v54 = vperm.slane %v102_v53, 0 }
  0xd0   :  { %v104_v56 = vmul.f32 %v103_v54, %v81_v34 }
  0xd2   :  { %v107_v57 = vadd.f32 %v417_v55, %v104_v56 }
  0xd4   :  { %406 = vmatmul.msk.f32.vlgmr.msra.gmra.mxu1 %vm42_vm0, %v107_v57 }
 0x151   :  { %v139_v59 = vpop.f32.mrf.mxu1 }
 0x152   :  { %v140_v60 = vadd.f32 %v418_v58, %v139_v59  ;;  %v288_v59 = vld [vmem:[#allocation2 + $0x138] sm:$0xff] }
 0x153   :  { %302 = vmatpush.msrb.mxu0 %v288_v59 }
 0x154   :  { %v142_v61 = vmax.f32 %v140_v60, 0.0 }
 0x156   :  { %v143_v62 = vrot.slane %v142_v61, 4 }
 0x158   :  { %v144_v63 = vadd.f32 %v143_v62, %v142_v61 }
 0x15a   :  { %v145_v2 = vrot.slane %v144_v63, 2 }
 0x15c   :  { %v146_v4 = vadd.f32 %v145_v2, %v144_v63  ;;  %v286_v63 = vld [vmem:[#allocation2 + $0x128] sm:$0xff] }
 0x15e   :  { %v147_v6 = vrot.slane %v146_v4, 1 }
 0x160   :  { %v148_v8 = vadd.f32 %v147_v6, %v146_v4 }
 0x162   :  { %v149_v10 = vmul.f32 %v148_v8, %v525_v29  ;;  %v281_v8 = vld [vmem:[#allocation2 + $0x100] sm:$0xff] }
 0x164   :  { %v150_v12 = vsub.f32 %v142_v61, %v149_v10  ;;  %v287_v61 = vld [vmem:[#allocation2 + $0x130] sm:$0xff] }
 0x165   :  { %303 = vmatpush.msrb.mxu0 %v287_v61 }
 0x166   :  { %v151_v14 = vmul.f32 %v150_v12, %v150_v12 }
 0x167   :  { %304 = vmatpush.msrb.mxu0 %v286_v63 }
 0x168   :  { %v152_v15 = vrot.slane %v151_v14, 4 }
 0x169   :  { %305 = vmatpush.msrb.mxu0 %v285_v1 }
 0x16a   :  { %v153_v16 = vadd.f32 %v152_v15, %v151_v14 }
 0x16b   :  { %306 = vmatpush.msrb.mxu0 %v284_v3 }
 0x16c   :  { %v154_v17 = vrot.slane %v153_v16, 2 }
 0x16d   :  { %307 = vmatpush.msrb.mxu0 %v283_v5 }
 0x16e   :  { %v155_v18 = vadd.f32 %v154_v17, %v153_v16 }
 0x16f   :  { %308 = vmatpush.msrb.mxu0 %v282_v7 }
 0x170   :  { %v156_v19 = vrot.slane %v155_v18, 1 }
 0x171   :  { %309 = vmatpush.msrb.mxu0 %v281_v8 }
 0x172   :  { %v157_v20 = vadd.f32 %v156_v19, %v155_v18  ;;  %v273_v19 = vld [vmem:[%s584_s2 + $0xa] sm:$0x1] }
 0x174   :  { %v158_v23 = vmul.f32 %v157_v20, %v525_v29 }
 0x176   :  { %v159_v25 = vadd.f32 1e-05, %v158_v23  ;;  %v422_v23 = vld [vmem:[%s584_s2 + $0xb] ss:$0 sm:$0xff] }
 0x178   :  { %430 = vrsqrt.f32 %v159_v25  ;;  %vm166_vm6 = vweird.f32 %v159_v25 }
 0x17e   :  { %v431_v30 = vpop.eup %430 }
 0x17f   :  { %v161_v31 = vmul.f32 %v431_v30, %v159_v25  ;;  %vm167_vm5 = vweird.f32 %v431_v30 }
 0x180   :  { %vm168_vm7 = vmor %vm166_vm6, %vm167_vm5 }
 0x181   :  { %v162_v32 = vmul.f32 %v431_v30, %v161_v31 }
 0x183   :  { %v163_v33 = vmul.f32 0.5, %v162_v32 }
 0x185   :  { %v164_v34 = vsub.f32 1.5, %v163_v33 }
 0x187   :  { %v165_v35 = vmul.f32 %v431_v30, %v164_v34 }
 0x189   :  { %v169_v37 = vsel %vm168_vm7, %v431_v30, %v165_v35 }
 0x18a   :  { %v171_v38 = vmul.f32 %v170_v36, %v169_v37 }
 0x18c   :  { %v172_v39 = vperm.slane %v171_v38, 0  ;;  %v357_v38 = vld [vmem:[#allocation2 + $0x178] sm:$0xff] }
 0x18d   :  { %371 = vmatpush.msrb.mxu1 %v357_v38 }
 0x18e   :  { %v173_v41 = vmul.f32 %v172_v39, %v150_v12 }
 0x190   :  { %v176_v42 = vadd.f32 %v419_v40, %v173_v41  ;;  %v356_v40 = vld [vmem:[#allocation2 + $0x170] sm:$0xff] }
 0x191   :  { %372 = vmatpush.msrb.mxu1 %v356_v40 }
 0x192   :  { %407 = vmatmul.msk.f32.vlgmr.msra.gmra.mxu2 %vm42_vm0, %v176_v42  ;;  %v355_v42 = vld [vmem:[#allocation2 + $0x168] sm:$0xff] }
 0x193   :  { %373 = vmatpush.msrb.mxu1 %v355_v42 }
 0x195   :  { %374 = vmatpush.msrb.mxu1 %v354_v44 }
 0x215   :  { %v208_v46 = vpop.f32.mrf.mxu2 }
 0x216   :  { %v209_v47 = vadd.f32 %v420_v45, %v208_v46  ;;  %v353_v46 = vld [vmem:[#allocation2 + $0x158] sm:$0xff] }
 0x217   :  { %375 = vmatpush.msrb.mxu1 %v353_v46 }
 0x218   :  { %408 = vmatmul.msk.f32.vlgmr.msra.gmra.mxu3 %vm42_vm0, %v209_v47 }
 0x29b   :  { %v242_v49 = vpop.f32.mrf.mxu3 }
 0x29c   :  { %v243_v50 = vadd.f32 %v421_v48, %v242_v49  ;;  %v352_v48 = vld [vmem:[#allocation2 + $0x150] sm:$0xff] }
 0x29d   :  { %376 = vmatpush.msrb.mxu1 %v352_v48 }
 0x29e   :  { %v245_v51 = vmax.f32 %v243_v50, 0.0  ;;  %v351_v50 = vld [vmem:[#allocation2 + $0x148] sm:$0xff] }
 0x29f   :  { %377 = vmatpush.msrb.mxu1 %v351_v50 }
 0x2a0   :  { %v246_v52 = vrot.slane %v245_v51, 4 }
 0x2a2   :  { %v247_v53 = vadd.f32 %v246_v52, %v245_v51 }
 0x2a4   :  { %v248_v54 = vrot.slane %v247_v53, 2 }
 0x2a6   :  { %v249_v55 = vadd.f32 %v248_v54, %v247_v53 }
 0x2a8   :  { %v250_v56 = vrot.slane %v249_v55, 1 }
 0x2aa   :  { %v251_v57 = vadd.f32 %v250_v56, %v249_v55 }
 0x2ac   :  { %v252_v58 = vmul.f32 %v251_v57, %v525_v29 }
 0x2ae   :  { %v253_v60 = vsub.f32 %v245_v51, %v252_v58  ;;  %v350_v51 = vld [vmem:[#allocation2 + $0x140] sm:$0xff] }
 0x2af   :  { %378 = vmatpush.msrb.mxu1 %v350_v51 }
 0x2b0   :  { %v254_v62 = vmul.f32 %v253_v60, %v253_v60 }
 0x2b2   :  { %v255_v0 = vrot.slane %v254_v62, 4 }
 0x2b4   :  { %v256_v2 = vadd.f32 %v255_v0, %v254_v62  ;;  %v342_v62 = vld [vmem:[%s584_s2 + $0xc] sm:$0x1] }
 0x2b6   :  { %v257_v4 = vrot.slane %v256_v2, 2 }
 0x2b8   :  { %v258_v6 = vadd.f32 %v257_v4, %v256_v2  ;;  %v425_v4 = vld [vmem:[%s584_s2 + $0x5] ss:$0 sm:$0xff] }
 0x2ba   :  { %v259_v9 = vrot.slane %v258_v6, 1 }
 0x2bc   :  { %v260_v10 = vadd.f32 %v259_v9, %v258_v6 }
 0x2be   :  { %v261_v11 = vmul.f32 %v260_v10, %v525_v29 }
 0x2c0   :  { %v262_v12 = vadd.f32 1e-05, %v261_v11 }
 0x2c2   :  { %432 = vrsqrt.f32 %v262_v12  ;;  %vm269_vm9 = vweird.f32 %v262_v12 }
 0x2c8   :  { %v433_v13 = vpop.eup %432 }
 0x2c9   :  { %v264_v14 = vmul.f32 %v433_v13, %v262_v12  ;;  %vm270_vm8 = vweird.f32 %v433_v13 }
 0x2ca   :  { %vm271_vm10 = vmor %vm269_vm9, %vm270_vm8 }
 0x2cb   :  { %v265_v15 = vmul.f32 %v433_v13, %v264_v14 }
 0x2cd   :  { %v266_v16 = vmul.f32 0.5, %v265_v15 }
 0x2cf   :  { %v267_v17 = vsub.f32 1.5, %v266_v16 }
 0x2d1   :  { %v268_v18 = vmul.f32 %v433_v13, %v267_v17 }
 0x2d3   :  { %v272_v20 = vsel %vm271_vm10, %v433_v13, %v268_v18 }
 0x2d4   :  { %v274_v21 = vmul.f32 %v273_v19, %v272_v20 }
 0x2d6   :  { %v275_v22 = vperm.slane %v274_v21, 0 }
 0x2d8   :  { %v276_v24 = vmul.f32 %v275_v22, %v253_v60 }
 0x2da   :  { %v279_v25 = vadd.f32 %v422_v23, %v276_v24 }
 0x2dc   :  { %409 = vmatmul.msk.f32.vlgmr.msrb.gmra.mxu0 %vm42_vm0, %v279_v25 }
 0x359   :  { %v311_v27 = vpop.f32.mrf.mxu0 }
 0x35a   :  { %v312_v28 = vadd.f32 %v423_v26, %v311_v27 }
 0x35c   :  { %v314_v30 = vmax.f32 %v312_v28, 0.0 }
 0x35e   :  { %v315_v31 = vrot.slane %v314_v30, 4 }
 0x360   :  { %v316_v32 = vadd.f32 %v315_v31, %v314_v30 }
 0x362   :  { %v317_v33 = vrot.slane %v316_v32, 2 }
 0x364   :  { %v318_v34 = vadd.f32 %v317_v33, %v316_v32 }
 0x366   :  { %v319_v35 = vrot.slane %v318_v34, 1 }
 0x368   :  { %v320_v36 = vadd.f32 %v319_v35, %v318_v34 }
 0x36a   :  { %v321_v37 = vmul.f32 %v320_v36, %v525_v29 }
 0x36c   :  { %v322_v39 = vsub.f32 %v314_v30, %v321_v37 }
 0x36e   :  { %v323_v41 = vmul.f32 %v322_v39, %v322_v39 }
 0x370   :  { %v324_v43 = vrot.slane %v323_v41, 4 }
 0x372   :  { %v325_v45 = vadd.f32 %v324_v43, %v323_v41 }
 0x374   :  { %v326_v47 = vrot.slane %v325_v45, 2 }
 0x376   :  { %v327_v49 = vadd.f32 %v326_v47, %v325_v45 }
 0x378   :  { %v328_v52 = vrot.slane %v327_v49, 1 }
 0x37a   :  { %v329_v53 = vadd.f32 %v328_v52, %v327_v49 }
 0x37c   :  { %v330_v54 = vmul.f32 %v329_v53, %v525_v29  ;;  %v424_v29 = vld [vmem:[%s584_s2 + $0xd] ss:$0 sm:$0xff] }
 0x37e   :  { %v331_v55 = vadd.f32 1e-05, %v330_v54 }
 0x380   :  { %434 = vrsqrt.f32 %v331_v55  ;;  %vm338_vm12 = vweird.f32 %v331_v55 }
 0x386   :  { %v435_v56 = vpop.eup %434 }
 0x387   :  { %v333_v57 = vmul.f32 %v435_v56, %v331_v55  ;;  %vm339_vm11 = vweird.f32 %v435_v56 }
 0x388   :  { %vm340_vm13 = vmor %vm338_vm12, %vm339_vm11 }
 0x389   :  { %v334_v58 = vmul.f32 %v435_v56, %v333_v57 }
 0x38b   :  { %v335_v59 = vmul.f32 0.5, %v334_v58 }
 0x38d   :  { %v336_v60 = vsub.f32 1.5, %v335_v59 }
 0x38f   :  { %v337_v61 = vmul.f32 %v435_v56, %v336_v60 }
 0x391   :  { %v341_v63 = vsel %vm340_vm13, %v435_v56, %v337_v61 }
 0x392   :  { %v343_v0 = vmul.f32 %v342_v62, %v341_v63 }
 0x394   :  { %v344_v1 = vperm.slane %v343_v0, 0 }
 0x396   :  { %v345_v2 = vmul.f32 %v344_v1, %v322_v39 }
 0x398   :  { %v348_v3 = vadd.f32 %v424_v29, %v345_v2 }
 0x39a   :  { %410 = vmatmul.msk.f32.vlgmr.msrb.gmra.mxu1 %vm42_vm0, %v348_v3 }
 0x417   :  { %v380_v5 = vpop.f32.mrf.mxu1 }
 0x418   :  { %v381_v6 = vadd.f32 %v425_v4, %v380_v5 }
 0x41a   :  { %v383_v7 = vmul.f32 0.5, %v381_v6 }
 0x41c   :  { %436 = vtanh.f32 %v383_v7 }
 0x422   :  { %v437_v8 = vpop.eup %436 }
 0x423   :  { %v385_v9 = vmul.f32 0.5, %v437_v8 }
 0x425   :  { %v386_v10 = vadd.f32 0.5, %v385_v9 }
 0x427   :  { %387 = vst [vmem:[#allocation5] sm:$0xff] %v386_v10 }
 0x428   :  { %398 = dma.vmem_to_hbm [thread:$0]  %s394_s20, 128, %s396_s22, [#allocation4]  }
 0x429   :  { %488 = dma.done.wait [#allocation4], 128  }
 0x42a   :  { %489 = vsyncadd [#allocation4], 4294967168 }
 0x42b   :  { %403 = vsyncpa [#allocation3], 1 }
 0x42c   :  { %404 = vsyncpa [#allocation4], 1 }

</bundles_post_ra>
